<compile_context>
chip_gen: v6e
topology: v6e:2x2x1
jax: 0.10.0
libtpu: 0.0.40
codegen_flags: <defaults>
</compile_context>

<pallas_src>
import jax
import jax.numpy as jnp
from jax import lax
from jax.experimental import pallas as pl
from jax.experimental.pallas import tpu as pltpu

EPS = 1e-5
MATMUL_DTYPE = jnp.bfloat16   # MXU operand dtype; accumulation/elementwise stay f32.


def _conv3_reflect(x, w_ref):
    """Reflection-pad-1, kernel-3 conv of one (C, L) sample via 3 shifted matmuls.

    x:      (C, L) f32 activation (L on lanes).
    w_ref:  (3, C, C) bf16 VMEM ref; w_ref[k][co, ci] is the tap for x[:, l + k - 1].
    Returns (h, s, sq): (C, L) f32 conv output, (C, 1) per-channel sum and
    sum-of-squares (BatchNorm partial statistics for this sample).
    """
    C, L = x.shape
    # Shifted copies with reflection boundaries (static slices; for L % 128 == 0
    # a pltpu.roll(x, +/-1, axis=1) lane-rotate + boundary fix is equivalent).
    x_prev = jnp.concatenate([x[:, 1:2], x[:, :L - 1]], axis=1).astype(MATMUL_DTYPE)
    x_next = jnp.concatenate([x[:, 1:L], x[:, L - 2:L - 1]], axis=1).astype(MATMUL_DTYPE)
    x_ctr = x.astype(MATMUL_DTYPE)

    h = jnp.dot(w_ref[0], x_prev, preferred_element_type=jnp.float32)
    h = h + jnp.dot(w_ref[1], x_ctr, preferred_element_type=jnp.float32)
    h = h + jnp.dot(w_ref[2], x_next, preferred_element_type=jnp.float32)

    s = jnp.sum(h, axis=1, keepdims=True)          # (C, 1)
    sq = jnp.sum(h * h, axis=1, keepdims=True)     # (C, 1)
    return h, s, sq


def conv1_kernel(x_ref, w_ref, h_ref, s_ref, sq_ref):
    # x_ref: (C, L) f32, w_ref: (3, C, C) bf16. Outputs: h (C, L), stats (C, 1).
    h, s, sq = _conv3_reflect(x_ref[...], w_ref)
    h_ref[...] = h
    s_ref[...] = s
    sq_ref[...] = sq


def bn_relu_conv2_kernel(h1_ref, scale_ref, bias_ref, w_ref, h_ref, s_ref, sq_ref):
    # Fused BN1 affine (f32) + ReLU, then conv2 + BN2 partial stats.
    a = jnp.maximum(h1_ref[...] * scale_ref[...] + bias_ref[...], 0.0)
    h, s, sq = _conv3_reflect(a, w_ref)
    h_ref[...] = h
    s_ref[...] = s
    sq_ref[...] = sq


def bn_residual_kernel(x_ref, h2_ref, scale_ref, bias_ref, o_ref):
    # out = x + BN2(conv2_out), as a single fused multiply-add + add, f32.
    o_ref[...] = x_ref[...] + h2_ref[...] * scale_ref[...] + bias_ref[...]


def _affine_from_stats(s, sq, gamma, beta, count):
    """Fold batch stats into fused per-channel scale/bias:
    y*scale + bias == (y - mean) * rsqrt(var + eps) * gamma + beta (biased var)."""
    mean = jnp.sum(s, axis=0) / count                                   # (C, 1)
    var = jnp.maximum(jnp.sum(sq, axis=0) / count - mean * mean, 0.0)   # (C, 1)
    scale = gamma.reshape(-1, 1) * lax.rsqrt(var + EPS)
    bias = beta.reshape(-1, 1) - mean * scale
    return scale, bias


def resnet_block(x, w1, g1, b1, w2, g2, b2):
    """x: (N, C, L) f32 (PyTorch NCL layout, kept as-is). w1/w2: (C, C, 3). g/b: (C,)."""
    N, C, L = x.shape
    assert L >= 2, "ReflectionPad1d(1) requires L >= 2"
    x = x.astype(jnp.float32)
    # (Cout, Cin, K) -> (K, Cout, Cin): w?k[k] is the (C, C) matmul for tap k.
    w1k = jnp.transpose(w1, (2, 0, 1)).astype(MATMUL_DTYPE)
    w2k = jnp.transpose(w2, (2, 0, 1)).astype(MATMUL_DTYPE)

    cparams = pltpu.CompilerParams(
        dimension_semantics=("parallel",),        # batch axis -> megacore on v7x
        vmem_limit_bytes=32 * 1024 * 1024)

    act_spec = pl.BlockSpec((None, C, L), lambda n: (n, 0, 0))   # one sample / step
    stat_spec = pl.BlockSpec((None, C, 1), lambda n: (n, 0, 0))
    w_spec = pl.BlockSpec((3, C, C), lambda n: (0, 0, 0))        # resident constants
    cvec_spec = pl.BlockSpec((C, 1), lambda n: (0, 0))

    act_shape = jax.ShapeDtypeStruct((N, C, L), jnp.float32)
    stat_shape = jax.ShapeDtypeStruct((N, C, 1), jnp.float32)

    # Pass 1: conv1 + per-sample BN1 partial statistics.
    h1, s1, sq1 = pl.pallas_call(
        conv1_kernel,
        grid=(N,),
        in_specs=[act_spec, w_spec],
        out_specs=(act_spec, stat_spec, stat_spec),
        out_shape=(act_shape, stat_shape, stat_shape),
        compiler_params=cparams,
    )(x, w1k)
    scale1, bias1 = _affine_from_stats(s1, sq1, g1, b1, N * L)

    # Pass 2: BN1 affine + ReLU + conv2 + per-sample BN2 partial statistics.
    h2, s2, sq2 = pl.pallas_call(
        bn_relu_conv2_kernel,
        grid=(N,),
        in_specs=[act_spec, cvec_spec, cvec_spec, w_spec],
        out_specs=(act_spec, stat_spec, stat_spec),
        out_shape=(act_shape, stat_shape, stat_shape),
        compiler_params=cparams,
    )(h1, scale1, bias1, w2k)
    scale2, bias2 = _affine_from_stats(s2, sq2, g2, b2, N * L)

    # Pass 3: BN2 affine + residual add.
    out = pl.pallas_call(
        bn_residual_kernel,
        grid=(N,),
        in_specs=[act_spec, act_spec, cvec_spec, cvec_spec],
        out_specs=act_spec,
        out_shape=act_shape,
        compiler_params=cparams,
    )(x, h2, scale2, bias2)
    return out


def ref_forward(x, w1, g1, b1, w2, g2, b2, matmul_dtype=jnp.float32):
    """Pure-JAX reference of the PyTorch forward (training-mode BatchNorm).
    `matmul_dtype` optionally rounds conv operands the same way the kernel does."""
    def rnd(a):
        return a.astype(matmul_dtype).astype(jnp.float32)

    def reflect_pad(a):
        return jnp.concatenate([a[:, :, 1:2], a, a[:, :, -2:-1]], axis=2)

    def conv(a, w):
        return lax.conv_general_dilated(
            reflect_pad(rnd(a)), rnd(w), window_strides=(1,), padding='VALID',
            dimension_numbers=('NCH', 'OIH', 'NCH'))

    def bn(y, g, b):
        mean = jnp.mean(y, axis=(0, 2), keepdims=True)
        var = jnp.mean((y - mean) ** 2, axis=(0, 2), keepdims=True)
        return (y - mean) / jnp.sqrt(var + EPS) * g.reshape(1, -1, 1) + b.reshape(1, -1, 1)

    h = jnp.maximum(bn(conv(x, w1), g1, b1), 0.0)
    h = bn(conv(h, w2), g2, b2)
    return x + h


if __name__ == "__main__":
    N, C, L = 2, 4, 16   # dim = 4
    key = jax.random.PRNGKey(0)
    kx, kw1, kw2 = jax.random.split(key, 3)

    x = jax.random.normal(kx, (N, C, L), dtype=jnp.float32)

    # Deterministic synthetic init (PyTorch-style uniform bound, BN affine defaults).
    bound = 1.0 / (C * 3) ** 0.5
    w1 = jax.random.uniform(kw1, (C, C, 3), jnp.float32, -bound, bound)
    w2 = jax.random.uniform(kw2, (C, C, 3), jnp.float32, -bound, bound)
    g1 = jnp.ones((C,), jnp.float32)
    b1 = jnp.zeros((C,), jnp.float32)
    g2 = jnp.ones((C,), jnp.float32)
    b2 = jnp.zeros((C,), jnp.float32)

    out = jax.block_until_ready(jax.jit(resnet_block)(x, w1, g1, b1, w2, g2, b2))
    assert out.shape == (N, C, L) and out.dtype == jnp.float32

    # Tight check vs. a reference whose matmul operands are rounded to the same
    # dtype the kernel feeds the MXU (isolates any kernel-structure error).
    ref_matched = ref_forward(x, w1, g1, b1, w2, g2, b2, matmul_dtype=MATMUL_DTYPE)
    assert jnp.allclose(out, ref_matched, atol=1e-3, rtol=1e-3), \
        f"max err vs matched ref {jnp.max(jnp.abs(out - ref_matched))}"

    # Coarse check vs. the full-f32 reference (error bounded by bf16 MXU operands).
    ref_f32 = ref_forward(x, w1, g1, b1, w2, g2, b2, matmul_dtype=jnp.float32)
    assert jnp.allclose(out, ref_f32, atol=1e-1, rtol=1e-1), \
        f"max err vs f32 ref {jnp.max(jnp.abs(out - ref_f32))}"

    print("KERNEL_OK")
</pallas_src>

<mosaic_0001>
module attributes {stable_mosaic.version = 11 : i64} {
  func.func @conv1_kernel(%arg0: i32, %arg1: memref<1x4x16xf32, #tpu.memory_space<vmem>>, %arg2: memref<3x4x4xbf16, #tpu.memory_space<vmem>>, %arg3: memref<1x4x16xf32, #tpu.memory_space<vmem>>, %arg4: memref<1x4x1xf32, #tpu.memory_space<vmem>>, %arg5: memref<1x4x1xf32, #tpu.memory_space<vmem>>) attributes {dimension_semantics = [#tpu.dimension_semantics<parallel>], iteration_bounds = array<i64: 2>, scalar_prefetch = 0 : i64, scratch_operands = 0 : i64, tpu.core_type = #tpu.core_type<tc>, window_params = [{transform_indices = @transform_0, window_bounds = array<i64: 1, 4, 16>}, {pipeline_mode = #tpu.pipeline_mode<synchronous>, transform_indices = @transform_1, window_bounds = array<i64: 3, 4, 4>}, {transform_indices = @transform_2, window_bounds = array<i64: 1, 4, 16>}, {transform_indices = @transform_3, window_bounds = array<i64: 1, 4, 1>}, {transform_indices = @transform_4, window_bounds = array<i64: 1, 4, 1>}]} {
    %c0 = arith.constant 0 : index
    %c0_0 = arith.constant 0 : index
    %c0_1 = arith.constant 0 : index
    %0 = vector.load %arg1[%c0, %c0_0, %c0_1] : memref<1x4x16xf32, #tpu.memory_space<vmem>>, vector<1x4x16xf32>
    %1 = vector.shape_cast %0 : vector<1x4x16xf32> to vector<4x16xf32>
    %2 = vector.extract_strided_slice %1 {offsets = [0, 1], sizes = [4, 1], strides = [1, 1]} : vector<4x16xf32> to vector<4x1xf32>
    %3 = vector.extract_strided_slice %1 {offsets = [0, 0], sizes = [4, 15], strides = [1, 1]} : vector<4x16xf32> to vector<4x15xf32>
    %4 = tpu.concatenate %2, %3 in 1 : vector<4x1xf32>, vector<4x15xf32> -> vector<4x16xf32>
    %5 = arith.truncf %4 : vector<4x16xf32> to vector<4x16xbf16>
    %6 = vector.extract_strided_slice %1 {offsets = [0, 1], sizes = [4, 15], strides = [1, 1]} : vector<4x16xf32> to vector<4x15xf32>
    %7 = vector.extract_strided_slice %1 {offsets = [0, 14], sizes = [4, 1], strides = [1, 1]} : vector<4x16xf32> to vector<4x1xf32>
    %8 = tpu.concatenate %6, %7 in 1 : vector<4x15xf32>, vector<4x1xf32> -> vector<4x16xf32>
    %9 = arith.truncf %8 : vector<4x16xf32> to vector<4x16xbf16>
    %10 = arith.truncf %1 : vector<4x16xf32> to vector<4x16xbf16>
    %c0_2 = arith.constant 0 : index
    %c0_3 = arith.constant 0 : index
    %c0_4 = arith.constant 0 : index
    %11 = vector.load %arg2[%c0_2, %c0_3, %c0_4] : memref<3x4x4xbf16, #tpu.memory_space<vmem>>, vector<1x4x4xbf16>
    %12 = vector.shape_cast %11 : vector<1x4x4xbf16> to vector<4x4xbf16>
    %cst = arith.constant dense<0.000000e+00> : vector<4x16xf32>
    %13 = tpu.matmul %12, %5, %cst {dimension_numbers = #tpu.dot_dimension_numbers<[1], [0], [0], [1], [0, 0, 1, 1], [], []>} : vector<4x4xbf16>, vector<4x16xbf16>, vector<4x16xf32> -> vector<4x16xf32>
    %c1 = arith.constant 1 : index
    %c0_5 = arith.constant 0 : index
    %c0_6 = arith.constant 0 : index
    %14 = vector.load %arg2[%c1, %c0_5, %c0_6] : memref<3x4x4xbf16, #tpu.memory_space<vmem>>, vector<1x4x4xbf16>
    %15 = vector.shape_cast %14 : vector<1x4x4xbf16> to vector<4x4xbf16>
    %cst_7 = arith.constant dense<0.000000e+00> : vector<4x16xf32>
    %16 = tpu.matmul %15, %10, %cst_7 {dimension_numbers = #tpu.dot_dimension_numbers<[1], [0], [0], [1], [0, 0, 1, 1], [], []>} : vector<4x4xbf16>, vector<4x16xbf16>, vector<4x16xf32> -> vector<4x16xf32>
    %17 = arith.addf %13, %16 : vector<4x16xf32>
    %c2 = arith.constant 2 : index
    %c0_8 = arith.constant 0 : index
    %c0_9 = arith.constant 0 : index
    %18 = vector.load %arg2[%c2, %c0_8, %c0_9] : memref<3x4x4xbf16, #tpu.memory_space<vmem>>, vector<1x4x4xbf16>
    %19 = vector.shape_cast %18 : vector<1x4x4xbf16> to vector<4x4xbf16>
    %cst_10 = arith.constant dense<0.000000e+00> : vector<4x16xf32>
    %20 = tpu.matmul %19, %9, %cst_10 {dimension_numbers = #tpu.dot_dimension_numbers<[1], [0], [0], [1], [0, 0, 1, 1], [], []>} : vector<4x4xbf16>, vector<4x16xbf16>, vector<4x16xf32> -> vector<4x16xf32>
    %21 = arith.addf %17, %20 : vector<4x16xf32>
    %cst_11 = arith.constant dense<0.000000e+00> : vector<4xf32>
    %22 = vector.multi_reduction <add>, %21, %cst_11 [1] : vector<4x16xf32> to vector<4xf32>
    %23 = vector.shape_cast %22 : vector<4xf32> to vector<4x1xf32>
    %24 = arith.mulf %21, %21 : vector<4x16xf32>
    %cst_12 = arith.constant dense<0.000000e+00> : vector<4xf32>
    %25 = vector.multi_reduction <add>, %24, %cst_12 [1] : vector<4x16xf32> to vector<4xf32>
    %26 = vector.shape_cast %25 : vector<4xf32> to vector<4x1xf32>
    %c0_13 = arith.constant 0 : index
    %c0_14 = arith.constant 0 : index
    %c0_15 = arith.constant 0 : index
    %27 = vector.load %arg3[%c0_13, %c0_14, %c0_15] : memref<1x4x16xf32, #tpu.memory_space<vmem>>, vector<1x4x16xf32>
    %28 = vector.shape_cast %27 : vector<1x4x16xf32> to vector<4x16xf32>
    %29 = vector.shape_cast %21 : vector<4x16xf32> to vector<1x4x16xf32>
    tpu.vector_store %arg3[%c0_13, %c0_14, %c0_15], %29 {strides = array<i32>} : memref<1x4x16xf32, #tpu.memory_space<vmem>>, vector<1x4x16xf32>,
    %c0_16 = arith.constant 0 : index
    %c0_17 = arith.constant 0 : index
    %c0_18 = arith.constant 0 : index
    %30 = vector.load %arg4[%c0_16, %c0_17, %c0_18] : memref<1x4x1xf32, #tpu.memory_space<vmem>>, vector<1x4x1xf32>
    %31 = vector.shape_cast %30 : vector<1x4x1xf32> to vector<4x1xf32>
    %32 = vector.shape_cast %23 : vector<4x1xf32> to vector<1x4x1xf32>
    tpu.vector_store %arg4[%c0_16, %c0_17, %c0_18], %32 {strides = array<i32>} : memref<1x4x1xf32, #tpu.memory_space<vmem>>, vector<1x4x1xf32>,
    %c0_19 = arith.constant 0 : index
    %c0_20 = arith.constant 0 : index
    %c0_21 = arith.constant 0 : index
    %33 = vector.load %arg5[%c0_19, %c0_20, %c0_21] : memref<1x4x1xf32, #tpu.memory_space<vmem>>, vector<1x4x1xf32>
    %34 = vector.shape_cast %33 : vector<1x4x1xf32> to vector<4x1xf32>
    %35 = vector.shape_cast %26 : vector<4x1xf32> to vector<1x4x1xf32>
    tpu.vector_store %arg5[%c0_19, %c0_20, %c0_21], %35 {strides = array<i32>} : memref<1x4x1xf32, #tpu.memory_space<vmem>>, vector<1x4x1xf32>,
    return
  }
  func.func @transform_0(%arg0: i32) -> (i32, i32, i32) {
    %c0_i32 = arith.constant 0 : i32
    %c0_i32_0 = arith.constant 0 : i32
    %c0_i32_1 = arith.constant 0 : i32
    return %arg0, %c0_i32, %c0_i32_0 : i32, i32, i32
  }
  func.func @transform_1(%arg0: i32) -> (i32, i32, i32) {
    %c0_i32 = arith.constant 0 : i32
    %c0_i32_0 = arith.constant 0 : i32
    %c0_i32_1 = arith.constant 0 : i32
    %c0_i32_2 = arith.constant 0 : i32
    return %c0_i32, %c0_i32_0, %c0_i32_1 : i32, i32, i32
  }
  func.func @transform_2(%arg0: i32) -> (i32, i32, i32) {
    %c0_i32 = arith.constant 0 : i32
    %c0_i32_0 = arith.constant 0 : i32
    %c0_i32_1 = arith.constant 0 : i32
    return %arg0, %c0_i32, %c0_i32_0 : i32, i32, i32
  }
  func.func @transform_3(%arg0: i32) -> (i32, i32, i32) {
    %c0_i32 = arith.constant 0 : i32
    %c0_i32_0 = arith.constant 0 : i32
    %c0_i32_1 = arith.constant 0 : i32
    return %arg0, %c0_i32, %c0_i32_0 : i32, i32, i32
  }
  func.func @transform_4(%arg0: i32) -> (i32, i32, i32) {
    %c0_i32 = arith.constant 0 : i32
    %c0_i32_0 = arith.constant 0 : i32
    %c0_i32_1 = arith.constant 0 : i32
    return %arg0, %c0_i32, %c0_i32_0 : i32, i32, i32
  }
}

module attributes {stable_mosaic.version = 11 : i64} {
  func.func @bn_relu_conv2_kernel(%arg0: i32, %arg1: memref<1x4x16xf32, #tpu.memory_space<vmem>>, %arg2: memref<4x1xf32, #tpu.memory_space<vmem>>, %arg3: memref<4x1xf32, #tpu.memory_space<vmem>>, %arg4: memref<3x4x4xbf16, #tpu.memory_space<vmem>>, %arg5: memref<1x4x16xf32, #tpu.memory_space<vmem>>, %arg6: memref<1x4x1xf32, #tpu.memory_space<vmem>>, %arg7: memref<1x4x1xf32, #tpu.memory_space<vmem>>) attributes {dimension_semantics = [#tpu.dimension_semantics<parallel>], iteration_bounds = array<i64: 2>, scalar_prefetch = 0 : i64, scratch_operands = 0 : i64, tpu.core_type = #tpu.core_type<tc>, window_params = [{transform_indices = @transform_0, window_bounds = array<i64: 1, 4, 16>}, {pipeline_mode = #tpu.pipeline_mode<synchronous>, transform_indices = @transform_1, window_bounds = array<i64: 4, 1>}, {pipeline_mode = #tpu.pipeline_mode<synchronous>, transform_indices = @transform_2, window_bounds = array<i64: 4, 1>}, {pipeline_mode = #tpu.pipeline_mode<synchronous>, transform_indices = @transform_3, window_bounds = array<i64: 3, 4, 4>}, {transform_indices = @transform_4, window_bounds = array<i64: 1, 4, 16>}, {transform_indices = @transform_5, window_bounds = array<i64: 1, 4, 1>}, {transform_indices = @transform_6, window_bounds = array<i64: 1, 4, 1>}]} {
    %c0 = arith.constant 0 : index
    %c0_0 = arith.constant 0 : index
    %c0_1 = arith.constant 0 : index
    %0 = vector.load %arg1[%c0, %c0_0, %c0_1] : memref<1x4x16xf32, #tpu.memory_space<vmem>>, vector<1x4x16xf32>
    %1 = vector.shape_cast %0 : vector<1x4x16xf32> to vector<4x16xf32>
    %c0_2 = arith.constant 0 : index
    %c0_3 = arith.constant 0 : index
    %2 = vector.load %arg2[%c0_2, %c0_3] : memref<4x1xf32, #tpu.memory_space<vmem>>, vector<4x1xf32>
    %3 = vector.broadcast %2 : vector<4x1xf32> to vector<4x16xf32>
    %4 = arith.mulf %1, %3 : vector<4x16xf32>
    %c0_4 = arith.constant 0 : index
    %c0_5 = arith.constant 0 : index
    %5 = vector.load %arg3[%c0_4, %c0_5] : memref<4x1xf32, #tpu.memory_space<vmem>>, vector<4x1xf32>
    %6 = vector.broadcast %5 : vector<4x1xf32> to vector<4x16xf32>
    %7 = arith.addf %4, %6 : vector<4x16xf32>
    %cst = arith.constant 0.000000e+00 : f32
    %8 = vector.broadcast %cst : f32 to vector<4x16xf32>
    %9 = arith.maximumf %7, %8 : vector<4x16xf32>
    %10 = vector.extract_strided_slice %9 {offsets = [0, 1], sizes = [4, 1], strides = [1, 1]} : vector<4x16xf32> to vector<4x1xf32>
    %11 = vector.extract_strided_slice %9 {offsets = [0, 0], sizes = [4, 15], strides = [1, 1]} : vector<4x16xf32> to vector<4x15xf32>
    %12 = tpu.concatenate %10, %11 in 1 : vector<4x1xf32>, vector<4x15xf32> -> vector<4x16xf32>
    %13 = arith.truncf %12 : vector<4x16xf32> to vector<4x16xbf16>
    %14 = vector.extract_strided_slice %9 {offsets = [0, 1], sizes = [4, 15], strides = [1, 1]} : vector<4x16xf32> to vector<4x15xf32>
    %15 = vector.extract_strided_slice %9 {offsets = [0, 14], sizes = [4, 1], strides = [1, 1]} : vector<4x16xf32> to vector<4x1xf32>
    %16 = tpu.concatenate %14, %15 in 1 : vector<4x15xf32>, vector<4x1xf32> -> vector<4x16xf32>
    %17 = arith.truncf %16 : vector<4x16xf32> to vector<4x16xbf16>
    %18 = arith.truncf %9 : vector<4x16xf32> to vector<4x16xbf16>
    %c0_6 = arith.constant 0 : index
    %c0_7 = arith.constant 0 : index
    %c0_8 = arith.constant 0 : index
    %19 = vector.load %arg4[%c0_6, %c0_7, %c0_8] : memref<3x4x4xbf16, #tpu.memory_space<vmem>>, vector<1x4x4xbf16>
    %20 = vector.shape_cast %19 : vector<1x4x4xbf16> to vector<4x4xbf16>
    %cst_9 = arith.constant dense<0.000000e+00> : vector<4x16xf32>
    %21 = tpu.matmul %20, %13, %cst_9 {dimension_numbers = #tpu.dot_dimension_numbers<[1], [0], [0], [1], [0, 0, 1, 1], [], []>} : vector<4x4xbf16>, vector<4x16xbf16>, vector<4x16xf32> -> vector<4x16xf32>
    %c1 = arith.constant 1 : index
    %c0_10 = arith.constant 0 : index
    %c0_11 = arith.constant 0 : index
    %22 = vector.load %arg4[%c1, %c0_10, %c0_11] : memref<3x4x4xbf16, #tpu.memory_space<vmem>>, vector<1x4x4xbf16>
    %23 = vector.shape_cast %22 : vector<1x4x4xbf16> to vector<4x4xbf16>
    %cst_12 = arith.constant dense<0.000000e+00> : vector<4x16xf32>
    %24 = tpu.matmul %23, %18, %cst_12 {dimension_numbers = #tpu.dot_dimension_numbers<[1], [0], [0], [1], [0, 0, 1, 1], [], []>} : vector<4x4xbf16>, vector<4x16xbf16>, vector<4x16xf32> -> vector<4x16xf32>
    %25 = arith.addf %21, %24 : vector<4x16xf32>
    %c2 = arith.constant 2 : index
    %c0_13 = arith.constant 0 : index
    %c0_14 = arith.constant 0 : index
    %26 = vector.load %arg4[%c2, %c0_13, %c0_14] : memref<3x4x4xbf16, #tpu.memory_space<vmem>>, vector<1x4x4xbf16>
    %27 = vector.shape_cast %26 : vector<1x4x4xbf16> to vector<4x4xbf16>
    %cst_15 = arith.constant dense<0.000000e+00> : vector<4x16xf32>
    %28 = tpu.matmul %27, %17, %cst_15 {dimension_numbers = #tpu.dot_dimension_numbers<[1], [0], [0], [1], [0, 0, 1, 1], [], []>} : vector<4x4xbf16>, vector<4x16xbf16>, vector<4x16xf32> -> vector<4x16xf32>
    %29 = arith.addf %25, %28 : vector<4x16xf32>
    %cst_16 = arith.constant dense<0.000000e+00> : vector<4xf32>
    %30 = vector.multi_reduction <add>, %29, %cst_16 [1] : vector<4x16xf32> to vector<4xf32>
    %31 = vector.shape_cast %30 : vector<4xf32> to vector<4x1xf32>
    %32 = arith.mulf %29, %29 : vector<4x16xf32>
    %cst_17 = arith.constant dense<0.000000e+00> : vector<4xf32>
    %33 = vector.multi_reduction <add>, %32, %cst_17 [1] : vector<4x16xf32> to vector<4xf32>
    %34 = vector.shape_cast %33 : vector<4xf32> to vector<4x1xf32>
    %c0_18 = arith.constant 0 : index
    %c0_19 = arith.constant 0 : index
    %c0_20 = arith.constant 0 : index
    %35 = vector.load %arg5[%c0_18, %c0_19, %c0_20] : memref<1x4x16xf32, #tpu.memory_space<vmem>>, vector<1x4x16xf32>
    %36 = vector.shape_cast %35 : vector<1x4x16xf32> to vector<4x16xf32>
    %37 = vector.shape_cast %29 : vector<4x16xf32> to vector<1x4x16xf32>
    tpu.vector_store %arg5[%c0_18, %c0_19, %c0_20], %37 {strides = array<i32>} : memref<1x4x16xf32, #tpu.memory_space<vmem>>, vector<1x4x16xf32>,
    %c0_21 = arith.constant 0 : index
    %c0_22 = arith.constant 0 : index
    %c0_23 = arith.constant 0 : index
    %38 = vector.load %arg6[%c0_21, %c0_22, %c0_23] : memref<1x4x1xf32, #tpu.memory_space<vmem>>, vector<1x4x1xf32>
    %39 = vector.shape_cast %38 : vector<1x4x1xf32> to vector<4x1xf32>
    %40 = vector.shape_cast %31 : vector<4x1xf32> to vector<1x4x1xf32>
    tpu.vector_store %arg6[%c0_21, %c0_22, %c0_23], %40 {strides = array<i32>} : memref<1x4x1xf32, #tpu.memory_space<vmem>>, vector<1x4x1xf32>,
    %c0_24 = arith.constant 0 : index
    %c0_25 = arith.constant 0 : index
    %c0_26 = arith.constant 0 : index
    %41 = vector.load %arg7[%c0_24, %c0_25, %c0_26] : memref<1x4x1xf32, #tpu.memory_space<vmem>>, vector<1x4x1xf32>
    %42 = vector.shape_cast %41 : vector<1x4x1xf32> to vector<4x1xf32>
    %43 = vector.shape_cast %34 : vector<4x1xf32> to vector<1x4x1xf32>
    tpu.vector_store %arg7[%c0_24, %c0_25, %c0_26], %43 {strides = array<i32>} : memref<1x4x1xf32, #tpu.memory_space<vmem>>, vector<1x4x1xf32>,
    return
  }
  func.func @transform_0(%arg0: i32) -> (i32, i32, i32) {
    %c0_i32 = arith.constant 0 : i32
    %c0_i32_0 = arith.constant 0 : i32
    %c0_i32_1 = arith.constant 0 : i32
    return %arg0, %c0_i32, %c0_i32_0 : i32, i32, i32
  }
  func.func @transform_1(%arg0: i32) -> (i32, i32) {
    %c0_i32 = arith.constant 0 : i32
    %c0_i32_0 = arith.constant 0 : i32
    %c0_i32_1 = arith.constant 0 : i32
    return %c0_i32, %c0_i32_0 : i32, i32
  }
  func.func @transform_2(%arg0: i32) -> (i32, i32) {
    %c0_i32 = arith.constant 0 : i32
    %c0_i32_0 = arith.constant 0 : i32
    %c0_i32_1 = arith.constant 0 : i32
    return %c0_i32, %c0_i32_0 : i32, i32
  }
  func.func @transform_3(%arg0: i32) -> (i32, i32, i32) {
    %c0_i32 = arith.constant 0 : i32
    %c0_i32_0 = arith.constant 0 : i32
    %c0_i32_1 = arith.constant 0 : i32
    %c0_i32_2 = arith.constant 0 : i32
    return %c0_i32, %c0_i32_0, %c0_i32_1 : i32, i32, i32
  }
  func.func @transform_4(%arg0: i32) -> (i32, i32, i32) {
    %c0_i32 = arith.constant 0 : i32
    %c0_i32_0 = arith.constant 0 : i32
    %c0_i32_1 = arith.constant 0 : i32
    return %arg0, %c0_i32, %c0_i32_0 : i32, i32, i32
  }
  func.func @transform_5(%arg0: i32) -> (i32, i32, i32) {
    %c0_i32 = arith.constant 0 : i32
    %c0_i32_0 = arith.constant 0 : i32
    %c0_i32_1 = arith.constant 0 : i32
    return %arg0, %c0_i32, %c0_i32_0 : i32, i32, i32
  }
  func.func @transform_6(%arg0: i32) -> (i32, i32, i32) {
    %c0_i32 = arith.constant 0 : i32
    %c0_i32_0 = arith.constant 0 : i32
    %c0_i32_1 = arith.constant 0 : i32
    return %arg0, %c0_i32, %c0_i32_0 : i32, i32, i32
  }
}

module attributes {stable_mosaic.version = 11 : i64} {
  func.func @bn_residual_kernel(%arg0: i32, %arg1: memref<1x4x16xf32, #tpu.memory_space<vmem>>, %arg2: memref<1x4x16xf32, #tpu.memory_space<vmem>>, %arg3: memref<4x1xf32, #tpu.memory_space<vmem>>, %arg4: memref<4x1xf32, #tpu.memory_space<vmem>>, %arg5: memref<1x4x16xf32, #tpu.memory_space<vmem>>) attributes {dimension_semantics = [#tpu.dimension_semantics<parallel>], iteration_bounds = array<i64: 2>, scalar_prefetch = 0 : i64, scratch_operands = 0 : i64, tpu.core_type = #tpu.core_type<tc>, window_params = [{transform_indices = @transform_0, window_bounds = array<i64: 1, 4, 16>}, {transform_indices = @transform_1, window_bounds = array<i64: 1, 4, 16>}, {pipeline_mode = #tpu.pipeline_mode<synchronous>, transform_indices = @transform_2, window_bounds = array<i64: 4, 1>}, {pipeline_mode = #tpu.pipeline_mode<synchronous>, transform_indices = @transform_3, window_bounds = array<i64: 4, 1>}, {transform_indices = @transform_4, window_bounds = array<i64: 1, 4, 16>}]} {
    %c0 = arith.constant 0 : index
    %c0_0 = arith.constant 0 : index
    %c0_1 = arith.constant 0 : index
    %0 = vector.load %arg1[%c0, %c0_0, %c0_1] : memref<1x4x16xf32, #tpu.memory_space<vmem>>, vector<1x4x16xf32>
    %1 = vector.shape_cast %0 : vector<1x4x16xf32> to vector<4x16xf32>
    %c0_2 = arith.constant 0 : index
    %c0_3 = arith.constant 0 : index
    %c0_4 = arith.constant 0 : index
    %2 = vector.load %arg2[%c0_2, %c0_3, %c0_4] : memref<1x4x16xf32, #tpu.memory_space<vmem>>, vector<1x4x16xf32>
    %3 = vector.shape_cast %2 : vector<1x4x16xf32> to vector<4x16xf32>
    %c0_5 = arith.constant 0 : index
    %c0_6 = arith.constant 0 : index
    %4 = vector.load %arg3[%c0_5, %c0_6] : memref<4x1xf32, #tpu.memory_space<vmem>>, vector<4x1xf32>
    %5 = vector.broadcast %4 : vector<4x1xf32> to vector<4x16xf32>
    %6 = arith.mulf %3, %5 : vector<4x16xf32>
    %7 = arith.addf %1, %6 : vector<4x16xf32>
    %c0_7 = arith.constant 0 : index
    %c0_8 = arith.constant 0 : index
    %8 = vector.load %arg4[%c0_7, %c0_8] : memref<4x1xf32, #tpu.memory_space<vmem>>, vector<4x1xf32>
    %9 = vector.broadcast %8 : vector<4x1xf32> to vector<4x16xf32>
    %10 = arith.addf %7, %9 : vector<4x16xf32>
    %c0_9 = arith.constant 0 : index
    %c0_10 = arith.constant 0 : index
    %c0_11 = arith.constant 0 : index
    %11 = vector.load %arg5[%c0_9, %c0_10, %c0_11] : memref<1x4x16xf32, #tpu.memory_space<vmem>>, vector<1x4x16xf32>
    %12 = vector.shape_cast %11 : vector<1x4x16xf32> to vector<4x16xf32>
    %13 = vector.shape_cast %10 : vector<4x16xf32> to vector<1x4x16xf32>
    tpu.vector_store %arg5[%c0_9, %c0_10, %c0_11], %13 {strides = array<i32>} : memref<1x4x16xf32, #tpu.memory_space<vmem>>, vector<1x4x16xf32>,
    return
  }
  func.func @transform_0(%arg0: i32) -> (i32, i32, i32) {
    %c0_i32 = arith.constant 0 : i32
    %c0_i32_0 = arith.constant 0 : i32
    %c0_i32_1 = arith.constant 0 : i32
    return %arg0, %c0_i32, %c0_i32_0 : i32, i32, i32
  }
  func.func @transform_1(%arg0: i32) -> (i32, i32, i32) {
    %c0_i32 = arith.constant 0 : i32
    %c0_i32_0 = arith.constant 0 : i32
    %c0_i32_1 = arith.constant 0 : i32
    return %arg0, %c0_i32, %c0_i32_0 : i32, i32, i32
  }
  func.func @transform_2(%arg0: i32) -> (i32, i32) {
    %c0_i32 = arith.constant 0 : i32
    %c0_i32_0 = arith.constant 0 : i32
    %c0_i32_1 = arith.constant 0 : i32
    return %c0_i32, %c0_i32_0 : i32, i32
  }
  func.func @transform_3(%arg0: i32) -> (i32, i32) {
    %c0_i32 = arith.constant 0 : i32
    %c0_i32_0 = arith.constant 0 : i32
    %c0_i32_1 = arith.constant 0 : i32
    return %c0_i32, %c0_i32_0 : i32, i32
  }
  func.func @transform_4(%arg0: i32) -> (i32, i32, i32) {
    %c0_i32 = arith.constant 0 : i32
    %c0_i32_0 = arith.constant 0 : i32
    %c0_i32_1 = arith.constant 0 : i32
    return %arg0, %c0_i32, %c0_i32_0 : i32, i32, i32
  }
}

</mosaic_0001>

<bundles_post_ra>
// kernel: resnet_block.3
= control target key start
LH: loop header
LB: loop body
LE: loop exit
PB: predicated region body
PF: predicated region fallthrough
CT: control target
= control target key end

     0   :  { %s592_s15 = smov 0   ;;  %s639_s0 = inlined_call_operand.vmem [shape: f32[2,4,16], index: 0, kind: input, shape index: {}]   ;;  %s640_s1 = inlined_call_operand.vmem [shape: bf16[3,4,4], index: 1, kind: input, shape index: {}]   ;;  %s641_s2 = inlined_call_operand.vmem [shape: f32[2,4,16], index: 2, kind: output, shape index: {0}]   ;;  %s642_s3 = inlined_call_operand.vmem [shape: f32[2,4,1], index: 3, kind: output, shape index: {1}]   ;;  %s643_s4 = inlined_call_operand.vmem [shape: f32[2,4,1], index: 4, kind: output, shape index: {2}]  }
   0x1 LB: > { %s503_s16 = sadd.s32 4294967295, %s561_s15   ;;  %p507_p0 = scmp.ge.s32.totalorder %s561_s15, 1  ;;  %s561_s15 = sphi %s592_s15, %s15_s15  }
   0x2   : > { %p166_p1 = scmp.lt.s32.totalorder %s561_s15, 3 }
   0x4   : > { %p167_p2 = pnand %p507_p0, %p166_p1 }
   0x5   : > { %p198_p3 = scmp.lt.s32.totalorder (!%p167_p2), %s503_s16, 1  ;;  %s565_s21 = smov (!%p167_p2), 127  }
   0x6   : > { %170 = sbr.rel (%p167_p2) target bundleno = 482 (0x1e2), region = 28  ;;  %s566_s24 = smov (!%p167_p2), 1  }
   0xb   : > { %v563_v0 = vmov 0.0   ;;  %vm564_vm0 = vmmov 0   ;;  %s645_s16 = smov (!%p198_p3, %s503_s16), 1  ;;  %vm237_vm1 = vcmask 1041408   ;;  %v512_v4 = vld [vmem:[%s640_s1 + $0x2] sm:$0x3] }
   0xc   : > { %525 = vmatprep.subr.bf16.mxu0 %v563_v0  ;;  %527 = vmatprep.mubr.msk.bf16.mxu0 %vm564_vm0, %v563_v0  ;;  %s602_s17 = sshll.u32 %s645_s16, 2  ;;  %vm233_vm2 = vcmask 31744   ;;  %vm223_vm3 = vcmask 7168   ;;  %vm226_vm4 = vcmask 121856   ;;  %v230_v13 = vld [vmem:[%s640_s1] sm:$0x3] }
   0xd   : > { %531 = vmatprep.subr.bf16.mxu1 %v563_v0  ;;  %533 = vmatprep.mubr.msk.bf16.mxu1 %vm564_vm0, %v563_v0  ;;  %s201_s20 = scalar_lea.vmem %s639_s0, %s602_s17  ;;  %v515_v14 = vld [vmem:[%s640_s1 + $0x4] sm:$0x3]  ;;  %s205_s5 = scalar_lea.vmem %s641_s2, %s602_s17  ;;  %vm376_vm5 = vcmask 125952   ;;  %vm385_vm6 = vcmask 3072  }
   0xe   : > { %v215_v1 = vld [vmem:[%s201_s20] sm:$0xf]  ;;  %s209_s8 = scalar_lea.vmem %s642_s3, %s602_s17  ;;  %s213_s11 = scalar_lea.vmem %s643_s4, %s602_s17 }
   0xf   : > { %217 = vrot.lane.b32.xlu0 %v215_v1, %s565_s21  ;;  %v229_v2 = vpack.c.bf16 %v215_v1, %v215_v1 }
  0x11   : > { %v239_v3 = vsel %vm237_vm1, %v229_v2, 0 }
  0x12   : > { %526 = vmatpush3.bf16.msra.mxu0 %v239_v3 }
  0x13   : > { %220 = vrot.lane.b32.xlu0 %v215_v1, %s566_s24  ;;  %537 = vmatprep.subr.bf16.mxu0 %v563_v0 }
  0x15   : > { %528 = vmatmul.mubr.msk.bf16.vlgmr.msra.gmra.mxu0 %vm233_vm2, %v512_v4 }
  0x16   : > { %539 = vmatprep.mubr.msk.bf16.mxu0 %vm564_vm0, %v563_v0 }
  0x81   : > { %v218_v5 = vpop.permute.xlu0 %217 }
  0x85   : > { %v221_v6 = vpop.permute.xlu0 %220 }
  0x86   : > { %v224_v7 = vsel %vm223_vm3, %v218_v5, %v221_v6  ;;  %v227_v8 = vsel %vm226_vm4, %v218_v5, %v221_v6 }
  0x87   : > { %v225_v9 = vpack.c.bf16 %v224_v7, %v224_v7  ;;  %v228_v10 = vpack.c.bf16 %v227_v8, %v227_v8 }
  0x89   : > { %v285_v11 = vsel %vm237_vm1, %v225_v9, 0  ;;  %v333_v12 = vsel %vm237_vm1, %v228_v10, 0 }
  0x8a   : > { %532 = vmatpush3.bf16.msra.mxu1 %v285_v11  ;;  %538 = vmatpush3.bf16.msra.mxu0 %v333_v12 }
  0x8d   : > { %534 = vmatmul.mubr.msk.bf16.vlgmr.msra.gmra.mxu1 %vm233_vm2, %v230_v13  ;;  %540 = vmatmul.mubr.msk.bf16.vlgmr.msra.gmra.mxu0 %vm233_vm2, %v515_v14 }
  0xd5   : > { %v275_v15 = vpop.f32.mrf.mxu0 }
  0xd7   : > { %v529_v16 = vpop.f32.mrf.mxu0 }
  0xd9   : > { %v278_v17 = vpop.f32.mrf.mxu0 }
  0xdb   : > { %v530_v18 = vpop.f32.mrf.mxu0 }
 0x14d   : > { %v321_v19 = vpop.f32.mrf.mxu1  ;;  %v369_v20 = vpop.f32.mrf.mxu0 }
 0x14e   : > { %v322_v21 = vadd.f32 %v321_v19, %v275_v15 }
 0x14f   : > { %v535_v22 = vpop.f32.mrf.mxu1  ;;  %v541_v23 = vpop.f32.mrf.mxu0 }
 0x150   : > { %v375_v24 = vadd.f32 %v369_v20, %v322_v21 }
 0x151   : > { %v324_v25 = vpop.f32.mrf.mxu1  ;;  %v372_v26 = vpop.f32.mrf.mxu0 }
 0x152   : > { %v377_v27 = vsel %vm376_vm5, %v375_v24, 0.0  ;;  %384 = vst.msk [vmem:[%s205_s5] sm:$0xf] %vm376_vm5, %v375_v24  ;;  %v380_v28 = vmul.f32 %v375_v24, %v375_v24 }
 0x153   : > { %v536_v29 = vpop.f32.mrf.mxu1  ;;  %378 = vadd.xlane.f32.xlu1 %v377_v27  ;;  %v542_v30 = vpop.f32.mrf.mxu0 }
 0x154   : > { %v381_v31 = vsel %vm376_vm5, %v380_v28, 0.0 }
 0x157   : > { %382 = vadd.xlane.f32.xlu1 %v381_v31 }
 0x1dc   : > { %v379_v32 = vpop.xlane.xlu1 %378 }
 0x1dd   : > { %386 = vst.msk [vmem:[%s209_s8] sm:$0xf] %vm385_vm6, %v379_v32 }
 0x1e0   : > { %v383_v33 = vpop.xlane.xlu1 %382 }
 0x1e1   : > { %387 = vst.msk [vmem:[%s213_s11] sm:$0xf] %vm385_vm6, %v383_v33 }
 0x1e2 PF: > { %s15_s15 = sadd.s32 1, %s561_s15  }
 0x1e3   : > { %p12_p4 = scmp.ge.s32.totalorder %s15_s15, 4  }
 0x1e5   :  { %14 = sbr.rel (!%p12_p4) target bundleno = 1 (0x1), region = 84 }

// kernel: resnet_block.5
= control target key start
LH: loop header
LB: loop body
LE: loop exit
PB: predicated region body
PF: predicated region fallthrough
CT: control target
= control target key end

     0   :  { %9 = vsyncpa [#allocation3], 0  ;;  %s551_s0 = inlined_call_operand.vmem [shape: f32[2,4,16], index: 0, kind: input, shape index: {}]   ;;  %s552_s1 = inlined_call_operand.vmem [shape: f32[2,4,16], index: 1, kind: input, shape index: {}]   ;;  %s553_s2 = inlined_call_operand.vmem [shape: f32[4,1], index: 2, kind: input, shape index: {}]   ;;  %s554_s3 = inlined_call_operand.vmem [shape: f32[4,1], index: 3, kind: input, shape index: {}]   ;;  %s555_s4 = inlined_call_operand.hbm [shape: f32[2,4,16], index: 4, kind: output, shape index: {}]  }
   0x1   :  { %11 = vsyncpa [#allocation3 + $0x1], 0  ;;  %s455_s15 = smov 0   ;;  %s457_s16 = smov 0  }
   0x2   :  { %s459_s17 = smov 0   ;;  %s461_s18 = smov 0  }
   0x3 LB: > { %s476_s19 = sadd.s32 4294967295, %s426_s18   ;;  %s314_s20 = sadd.s32 4294967294, %s426_s18   ;;  %s426_s18 = sphi %s461_s18, %s561_s18   ;;  %s422_s17 = sphi %s459_s17, %s560_s17   ;;  %s418_s16 = sphi %s457_s16, %s559_s16   ;;  %s414_s15 = sphi %s455_s15, %s558_s15  }
   0x4   : > { %s480_s21 = sadd.s32 1, %s426_s18   ;;  %s118_s22 = sadd.s32 1, %s422_s17 }
   0x5   : > { %s115_s23 = ssub.s32 %s426_s18, %s480_s21  ;;  %p128_p0 = scmp.ne.s32.totalorder %s422_s17, %s418_s16 }
   0x6   : > { %p116_p1 = scmp.eq.s32.totalorder %s115_s23, 0  ;;  %p129_p2 = scmp.eq.s32.totalorder %s476_s19, 1 }
   0x7   : > { %p134_p3 = scmp.ne.s32.totalorder %s418_s16, %s414_s15  ;;  %p135_p4 = scmp.eq.s32.totalorder %s314_s20, 1 }
   0x8   : > { %s491_s24 = scalar_select %p116_p1, %s422_s17, %s118_s22  }
   0x9   : > { %p493_p5 = por %p129_p2, %p128_p0  ;;  %p497_p6 = por %p135_p4, %p134_p3 }
   0xa   : > { %p317_p7 = scmp.ge.s32.totalorder %s426_s18, 1  ;;  %p173_p8 = scmp.lt.s32.totalorder %s426_s18, 3 }
   0xc   : > { %p174_p9 = pnand %p317_p7, %p173_p8 }
   0xd   : > { %p202_p10 = scmp.lt.s32.totalorder (!%p174_p9), %s476_s19, 1  ;;  %s199_s7 = sand.u32 (!%p174_p9), 1, %s418_s16  }
   0xe   : > { %177 = sbr.rel (%p174_p9) target bundleno = 164 (0xa4), region = 36  ;;  %s318_s11 = sshll.u32 (!%p174_p9), %s199_s7, 2 }
   0xf   : > { %s322_s20 = sshll.u32 (!%p174_p9), %s476_s19, 6  ;;  %s201_s22 = scalar_lea.vmem (!%p174_p9), [#allocation2], %s318_s11 }
  0x10   : > { %s243_s23 = sshll.u32 (!%p174_p9), %s201_s22, 4  ;;  %s241_s29 = scalar_lea.hbm (!%p174_p9), %s555_s4, %s322_s20  ;;  %s244_s23 = int_to_ptr.vmem [resolvable:$true] %s243_s23 }
  0x11   : > { %s230_s30 = scalar_lea.sflag (!%p174_p9), [#allocation3], %s199_s7 }
  0x13   : > { %v212_v0 = vld [vmem:[%s553_s2] sm:$0xf]  ;;  %v428_v1 = vmov 0   ;;  %s203_s5 = scalar_select %p202_p10, %s476_s19, 1  ;;  %vm227_vm0 = vcmask 125952  }
  0x14   : > { %365 = vset.pattern.permute.xlu0 %v428_v1  ;;  %v220_v2 = vld [vmem:[%s554_s3] sm:$0xf] }
  0x15   : > { %215 = vperm.xlu0 %365, %v212_v0   ;;  %s319_s6 = sshll.u32 %s203_s5, 2  ;;  %s366_s5 = scalar_lea.vmem %s244_s23, 64 }
  0x16   : > { %s209_s10 = scalar_lea.vmem %s552_s1, %s319_s6  ;;  %s205_s14 = scalar_lea.vmem %s551_s0, %s319_s6 }
  0x17   : > { %v211_v3 = vld [vmem:[%s209_s10] sm:$0xf]  ;;  %p367_p11 = scmp.ne.s32.totalorder %s244_s23, %s366_s5  ;;  %s429_s6 = smov [#allocation2]  }
  0x18   : > { %v210_v5 = vld [vmem:[%s205_s14] sm:$0xf]  ;;  %s370_s19 = sshll.u32 %s429_s6, 4  ;;  %s371_s19 = int_to_ptr.vmem [resolvable:$false] %s370_s19 }
  0x19   : > { %223 = vperm.xlu0 %365, %v220_v2   ;;  %p368_p12 = pnand %p367_p11, %p493_p5  ;;  %s372_s8 = scalar_lea.vmem %s371_s19, 128 }
  0x1a   : > { %p373_p0 = scmp.lt.s32.totalorder %s244_s23, %s371_s19  ;;  %p374_p1 = scmp.lt.s32.totalorder %s372_s8, %s366_s5 }
  0x1b   : > { %p369_p13 = pneg %p368_p12 }
  0x1c   : > { %p375_p2 = por %p374_p1, %p373_p0 }
  0x1e   : > { %p376_p3 = pnand %p375_p2, %p369_p13 }
  0x90   : > { %v216_v4 = vpop.permute.xlu0 %215 }
  0x91   : > { %v218_v6 = vmul.f32 %v216_v4, %v211_v3 }
  0x93   : > { %v219_v7 = vadd.f32 %v218_v6, %v210_v5 }
  0x94   : > { %v224_v8 = vpop.permute.xlu0 %223 }
  0x95   : > { %v226_v9 = vadd.f32 %v224_v8, %v219_v7 }
  0x97   : > { %228 = vst.msk [vmem:[%s201_s22] sm:$0xf] %vm227_vm0, %v226_v9 }
  0x98   : > { %379 = shalt.err (!%p376_p3)
}
  0x99   : > { %s380_s9 = scalar_lea.hbm %s241_s29, 64  ;;  %s384_s11 = scalar_lea.hbm %s555_s4, 128 }
  0x9a   : > { %p381_p4 = scmp.ne.s32.totalorder %s241_s29, %s380_s9  ;;  %p385_p9 = scmp.lt.s32.totalorder %s241_s29, %s555_s4 }
  0x9b   : > { %p386_p10 = scmp.lt.s32.totalorder %s384_s11, %s380_s9 }
  0x9c   : > { %p382_p7 = pnand %p381_p4, %p493_p5 }
  0x9d   : > { %p387_p11 = por %p386_p10, %p385_p9 }
  0x9e   : > { %p383_p8 = pneg %p382_p7 }
  0xa0   : > { %p388_p12 = pnand %p387_p11, %p383_p8 }
  0xa2   : > { %391 = shalt.err (!%p388_p12)
}
  0xa3   : > { %325 = dma.vmem_to_hbm [thread:$0]  (%p493_p5), %s244_s23, 64, %s241_s29, %s230_s30  }
  0xa4 PF: > { %p331_p13 = scmp.ge.s32.totalorder %s426_s18, 2  ;;  %s255_s14 = sand.u32 1, %s414_s15  }
  0xa5   : > { %s256_s20 = scalar_lea.sflag [#allocation3], %s255_s14 }
  0xa6   : > { %p328_p0 = pnand %p331_p13, %p497_p6 }
  0xa8   : > { %p329_p1 = pneg %p328_p0 }
  0xaa   : > { %409 = dma.done.wait (%p329_p1), %s256_s20, 64  }
  0xab   : > { %411 = vsyncadd (%p329_p1), %s256_s20, 4294967232  ;;  %p14_p2 = scmp.ge.s32.totalorder %s480_s21, 4   ;;  %s558_s15 = smov %s418_s16 }
  0xac   : > { %s559_s16 = smov %s422_s17  ;;  %s560_s17 = smov %s491_s24 }
  0xad   : > { %s561_s18 = smov %s480_s21  ;;  %16 = sbr.rel (!%p14_p2) target bundleno = 3 (0x3), region = 74 }
  0xb2   :  { %261 = vsyncpa [#allocation3], 1 }
  0xb3   :  { %263 = vsyncpa [#allocation3 + $0x1], 1 }

// kernel: resnet_block.4
= control target key start
LH: loop header
LB: loop body
LE: loop exit
PB: predicated region body
PF: predicated region fallthrough
CT: control target
= control target key end

     0   :  { %s674_s21 = smov 0   ;;  %s727_s0 = inlined_call_operand.vmem [shape: f32[2,4,16], index: 0, kind: input, shape index: {}]   ;;  %s728_s1 = inlined_call_operand.vmem [shape: f32[4,1], index: 1, kind: input, shape index: {}]   ;;  %s729_s2 = inlined_call_operand.vmem [shape: f32[4,1], index: 2, kind: input, shape index: {}]   ;;  %s730_s3 = inlined_call_operand.vmem [shape: bf16[3,4,4], index: 3, kind: input, shape index: {}]   ;;  %s731_s4 = inlined_call_operand.vmem [shape: f32[2,4,16], index: 4, kind: output, shape index: {0}]   ;;  %s732_s5 = inlined_call_operand.vmem [shape: f32[2,4,1], index: 5, kind: output, shape index: {1}]   ;;  %s733_s6 = inlined_call_operand.vmem [shape: f32[2,4,1], index: 6, kind: output, shape index: {2}]  }
   0x1 LB: > { %s572_s22 = sadd.s32 4294967295, %s632_s21   ;;  %p576_p0 = scmp.ge.s32.totalorder %s632_s21, 1  ;;  %s632_s21 = sphi %s674_s21, %s17_s21  }
   0x2   : > { %p216_p1 = scmp.lt.s32.totalorder %s632_s21, 3 }
   0x4   : > { %p217_p2 = pnand %p576_p0, %p216_p1 }
   0x5   : > { %p252_p3 = scmp.lt.s32.totalorder (!%p217_p2), %s572_s22, 1  ;;  %s637_s7 = smov (!%p217_p2), 127  }
   0x6   : > { %220 = sbr.rel (%p217_p2) target bundleno = 610 (0x262), region = 36  ;;  %s638_s10 = smov (!%p217_p2), 1  }
   0xb   : > { %v270_v0 = vld [vmem:[%s728_s1] sm:$0xf]  ;;  %v634_v1 = vmov 0   ;;  %v635_v3 = vmov 0.0   ;;  %s735_s22 = smov (!%p252_p3, %s572_s22), 1  ;;  %vm636_vm0 = vmmov 0  }
   0xc   : > { %625 = vset.pattern.permute.xlu0 %v634_v1  ;;  %v277_v2 = vld [vmem:[%s729_s2] sm:$0xf]  ;;  %594 = vmatprep.subr.bf16.mxu0 %v635_v3  ;;  %s688_s27 = sshll.u32 %s735_s22, 2  ;;  %vm306_vm1 = vcmask 1041408   ;;  %vm302_vm2 = vcmask 31744   ;;  %vm292_vm3 = vcmask 7168  }
   0xd   : > { %273 = vperm.xlu0 %625, %v270_v0   ;;  %600 = vmatprep.subr.bf16.mxu1 %v635_v3  ;;  %s255_s30 = scalar_lea.vmem %s727_s0, %s688_s27  ;;  %v581_v12 = vld [vmem:[%s730_s3 + $0x2] sm:$0x3]  ;;  %vm295_vm4 = vcmask 121856   ;;  %v299_v21 = vld [vmem:[%s730_s3] sm:$0x3]  ;;  %s259_s17 = scalar_lea.vmem %s731_s4, %s688_s27  ;;  %vm445_vm5 = vcmask 125952  }
   0xe   : > { %596 = vmatprep.mubr.msk.bf16.mxu0 %vm636_vm0, %v635_v3  ;;  %602 = vmatprep.mubr.msk.bf16.mxu1 %vm636_vm0, %v635_v3  ;;  %v269_v5 = vld [vmem:[%s255_s30] sm:$0xf]  ;;  %v584_v22 = vld [vmem:[%s730_s3 + $0x4] sm:$0x3]  ;;  %s263_s20 = scalar_lea.vmem %s732_s5, %s688_s27  ;;  %vm454_vm6 = vcmask 3072   ;;  %s267_s24 = scalar_lea.vmem %s733_s6, %s688_s27 }
  0x11   : > { %280 = vperm.xlu0 %625, %v277_v2  }
  0x88   : > { %v274_v4 = vpop.permute.xlu0 %273 }
  0x89   : > { %v276_v6 = vmul.f32 %v274_v4, %v269_v5 }
  0x8c   : > { %v281_v7 = vpop.permute.xlu0 %280 }
  0x8d   : > { %v283_v8 = vadd.f32 %v281_v7, %v276_v6 }
  0x8f   : > { %v284_v9 = vmax.f32 %v283_v8, 0.0 }
  0x91   : > { %286 = vrot.lane.b32.xlu1 %v284_v9, %s637_s7  ;;  %v298_v10 = vpack.c.bf16 %v284_v9, %v284_v9 }
  0x93   : > { %v308_v11 = vsel %vm306_vm1, %v298_v10, 0 }
  0x94   : > { %595 = vmatpush3.bf16.msra.mxu0 %v308_v11 }
  0x95   : > { %289 = vrot.lane.b32.xlu1 %v284_v9, %s638_s10  ;;  %606 = vmatprep.subr.bf16.mxu0 %v635_v3 }
  0x97   : > { %597 = vmatmul.mubr.msk.bf16.vlgmr.msra.gmra.mxu0 %vm302_vm2, %v581_v12 }
  0x98   : > { %608 = vmatprep.mubr.msk.bf16.mxu0 %vm636_vm0, %v635_v3 }
 0x103   : > { %v287_v13 = vpop.permute.xlu1 %286 }
 0x107   : > { %v290_v14 = vpop.permute.xlu1 %289 }
 0x108   : > { %v293_v15 = vsel %vm292_vm3, %v287_v13, %v290_v14  ;;  %v296_v16 = vsel %vm295_vm4, %v287_v13, %v290_v14 }
 0x109   : > { %v294_v17 = vpack.c.bf16 %v293_v15, %v293_v15  ;;  %v297_v18 = vpack.c.bf16 %v296_v16, %v296_v16 }
 0x10b   : > { %v354_v19 = vsel %vm306_vm1, %v294_v17, 0  ;;  %v402_v20 = vsel %vm306_vm1, %v297_v18, 0 }
 0x10c   : > { %601 = vmatpush3.bf16.msra.mxu1 %v354_v19  ;;  %607 = vmatpush3.bf16.msra.mxu0 %v402_v20 }
 0x10f   : > { %603 = vmatmul.mubr.msk.bf16.vlgmr.msra.gmra.mxu1 %vm302_vm2, %v299_v21  ;;  %609 = vmatmul.mubr.msk.bf16.vlgmr.msra.gmra.mxu0 %vm302_vm2, %v584_v22 }
 0x157   : > { %v344_v23 = vpop.f32.mrf.mxu0 }
 0x159   : > { %v598_v24 = vpop.f32.mrf.mxu0 }
 0x15b   : > { %v347_v25 = vpop.f32.mrf.mxu0 }
 0x15d   : > { %v599_v26 = vpop.f32.mrf.mxu0 }
 0x1cf   : > { %v390_v27 = vpop.f32.mrf.mxu1  ;;  %v438_v28 = vpop.f32.mrf.mxu0 }
 0x1d0   : > { %v391_v29 = vadd.f32 %v390_v27, %v344_v23 }
 0x1d1   : > { %v604_v30 = vpop.f32.mrf.mxu1  ;;  %v610_v31 = vpop.f32.mrf.mxu0 }
 0x1d2   : > { %v444_v32 = vadd.f32 %v438_v28, %v391_v29 }
 0x1d3   : > { %v393_v33 = vpop.f32.mrf.mxu1  ;;  %v441_v34 = vpop.f32.mrf.mxu0 }
 0x1d4   : > { %v446_v35 = vsel %vm445_vm5, %v444_v32, 0.0  ;;  %453 = vst.msk [vmem:[%s259_s17] sm:$0xf] %vm445_vm5, %v444_v32  ;;  %v449_v36 = vmul.f32 %v444_v32, %v444_v32 }
 0x1d5   : > { %v605_v37 = vpop.f32.mrf.mxu1  ;;  %447 = vadd.xlane.f32.xlu0 %v446_v35  ;;  %v611_v38 = vpop.f32.mrf.mxu0 }
 0x1d6   : > { %v450_v39 = vsel %vm445_vm5, %v449_v36, 0.0 }
 0x1d7   : > { %451 = vadd.xlane.f32.xlu1 %v450_v39 }
 0x25e   : > { %v448_v40 = vpop.xlane.xlu0 %447 }
 0x25f   : > { %455 = vst.msk [vmem:[%s263_s20] sm:$0xf] %vm454_vm6, %v448_v40 }
 0x260   : > { %v452_v41 = vpop.xlane.xlu1 %451 }
 0x261   : > { %456 = vst.msk [vmem:[%s267_s24] sm:$0xf] %vm454_vm6, %v452_v41 }
 0x262 PF: > { %s17_s21 = sadd.s32 1, %s632_s21  }
 0x263   : > { %p14_p4 = scmp.ge.s32.totalorder %s17_s21, 4  }
 0x265   :  { %16 = sbr.rel (!%p14_p4) target bundleno = 1 (0x1), region = 92 }

</bundles_post_ra>
